<compile_context>
chip_gen: v7x
topology: tpu7x:2x2x1
jax: 0.10.0
libtpu: 0.0.40
codegen_flags: <defaults>
</compile_context>

<pallas_src>
import functools

import jax
import jax.numpy as jnp
from jax.experimental import pallas as pl
from jax.experimental.pallas import tpu as pltpu

IN_FEATURES = 28 * 28       # 784
LATENT = 20
LATENT_PAD = 128            # lane-dense padded latent width
MAX_TILE_B = 512            # multiple of 8; sized for v7x VMEM budget


def _ae_kernel(x_ref, we_ref, be_ref, wd_ref, bd_ref, o_ref):
    # Encoder: (TILE_B, 784) @ (784, 128) + (1, 128)   (cols >= 20 are zero)
    x = x_ref[...]
    latent = jnp.dot(x, we_ref[...], preferred_element_type=jnp.float32)
    latent = latent + be_ref[...]
    # Decoder: (TILE_B, 128) @ (128, 784) + (1, 784), then tanh.
    out = jnp.dot(latent, wd_ref[...], preferred_element_type=jnp.float32)
    out = out + bd_ref[...]
    o_ref[...] = jnp.tanh(out).astype(o_ref.dtype)


def prepare_params(w_enc, b_enc, w_dec, b_dec):
    """One-time parameter preprocessing (hoisted out of the hot path).

    Inputs use the PyTorch Linear (out, in) convention:
      w_enc: (20, 784), b_enc: (20,), w_dec: (784, 20), b_dec: (784,)
    Returns matmul-friendly, latent-padded tensors:
      we: (784, 128), be: (1, 128), wd: (128, 784), bd: (1, 784)
    """
    we = jnp.zeros((IN_FEATURES, LATENT_PAD), dtype=w_enc.dtype)
    we = we.at[:, :LATENT].set(w_enc.T)

    be = jnp.zeros((1, LATENT_PAD), dtype=b_enc.dtype)
    be = be.at[0, :LATENT].set(b_enc)

    wd = jnp.zeros((LATENT_PAD, IN_FEATURES), dtype=w_dec.dtype)
    wd = wd.at[:LATENT, :].set(w_dec.T)

    bd = b_dec.reshape(1, IN_FEATURES)
    return we, be, wd, bd


@functools.partial(jax.jit, static_argnames=())
def general_ae_forward(x, we, be, wd, bd):
    """x: (B, 1, 28, 28) float32. Params already preprocessed by prepare_params."""
    batch = x.shape[0]
    x_flat = x.reshape(batch, IN_FEATURES)

    # Tile the batch: multiple of 8 (f32 sublane), capped for VMEM budget.
    tile_b = min(MAX_TILE_B, max(8, ((batch + 7) // 8) * 8))
    grid = (pl.cdiv(batch, tile_b),)

    out_flat = pl.pallas_call(
        _ae_kernel,
        out_shape=jax.ShapeDtypeStruct((batch, IN_FEATURES), x.dtype),
        grid_spec=pltpu.PrefetchScalarGridSpec(
            num_scalar_prefetch=0,
            grid=grid,
            in_specs=[
                # Per-tile activations.
                pl.BlockSpec((tile_b, IN_FEATURES), lambda i: (i, 0)),
                # Resident weights / biases (same block every grid step).
                pl.BlockSpec((IN_FEATURES, LATENT_PAD), lambda i: (0, 0)),
                pl.BlockSpec((1, LATENT_PAD), lambda i: (0, 0)),
                pl.BlockSpec((LATENT_PAD, IN_FEATURES), lambda i: (0, 0)),
                pl.BlockSpec((1, IN_FEATURES), lambda i: (0, 0)),
            ],
            out_specs=pl.BlockSpec((tile_b, IN_FEATURES), lambda i: (i, 0)),
        ),
        compiler_params=pltpu.CompilerParams(
            dimension_semantics=("parallel",),
        ),
    )(x_flat, we, be, wd, bd)

    return out_flat.reshape(batch, 1, 28, 28)


def _reference_forward(x, w_enc, b_enc, w_dec, b_dec):
    """Pure-JAX reference mirroring the PyTorch module (raw (out,in) weights)."""
    batch = x.shape[0]
    xf = x.reshape(batch, -1)
    latent = xf @ w_enc.T + b_enc
    out = jnp.tanh(latent @ w_dec.T + b_dec)
    return out.reshape(batch, 1, 28, 28)


if __name__ == "__main__":
    key = jax.random.PRNGKey(0)
    k_x, k_we, k_be, k_wd, k_bd = jax.random.split(key, 5)

    batch = 2
    x = jax.random.normal(k_x, (batch, 1, 28, 28), dtype=jnp.float32)

    # Deterministic synthetic parameters (PyTorch Linear shapes: (out, in)).
    w_enc = jax.random.normal(k_we, (LATENT, IN_FEATURES), dtype=jnp.float32) * 0.05
    b_enc = jax.random.normal(k_be, (LATENT,), dtype=jnp.float32) * 0.05
    w_dec = jax.random.normal(k_wd, (IN_FEATURES, LATENT), dtype=jnp.float32) * 0.05
    b_dec = jax.random.normal(k_bd, (IN_FEATURES,), dtype=jnp.float32) * 0.05

    # One-time preprocessing (outside the hot path).
    we, be, wd, bd = prepare_params(w_enc, b_enc, w_dec, b_dec)

    out = general_ae_forward(x, we, be, wd, bd)
    out = jax.block_until_ready(out)

    ref = _reference_forward(x, w_enc, b_enc, w_dec, b_dec)
    assert out.shape == (batch, 1, 28, 28), out.shape
    assert jnp.allclose(out, ref, atol=1e-5, rtol=1e-5), "mismatch vs reference"

    print("KERNEL_OK")
</pallas_src>

<mosaic_0001>
module attributes {stable_mosaic.version = 11 : i64} {
  func.func @_ae_kernel(%arg0: i32, %arg1: memref<8x784xf32, #tpu.memory_space<vmem>>, %arg2: memref<784x128xf32, #tpu.memory_space<vmem>>, %arg3: memref<1x128xf32, #tpu.memory_space<vmem>>, %arg4: memref<128x784xf32, #tpu.memory_space<vmem>>, %arg5: memref<1x784xf32, #tpu.memory_space<vmem>>, %arg6: memref<8x784xf32, #tpu.memory_space<vmem>>) attributes {dimension_semantics = [#tpu.dimension_semantics<parallel>], iteration_bounds = array<i64: 1>, scalar_prefetch = 0 : i64, scratch_operands = 0 : i64, tpu.core_type = #tpu.core_type<tc>, window_params = [{transform_indices = @transform_0, window_bounds = array<i64: 8, 784>}, {pipeline_mode = #tpu.pipeline_mode<synchronous>, transform_indices = @transform_1, window_bounds = array<i64: 784, 128>}, {pipeline_mode = #tpu.pipeline_mode<synchronous>, transform_indices = @transform_2, window_bounds = array<i64: 1, 128>}, {pipeline_mode = #tpu.pipeline_mode<synchronous>, transform_indices = @transform_3, window_bounds = array<i64: 128, 784>}, {pipeline_mode = #tpu.pipeline_mode<synchronous>, transform_indices = @transform_4, window_bounds = array<i64: 1, 784>}, {transform_indices = @transform_5, window_bounds = array<i64: 8, 784>}]} {
    %c0 = arith.constant 0 : index
    %c0_0 = arith.constant 0 : index
    %0 = vector.load %arg1[%c0, %c0_0] : memref<8x784xf32, #tpu.memory_space<vmem>>, vector<8x784xf32>
    %c0_1 = arith.constant 0 : index
    %c0_2 = arith.constant 0 : index
    %1 = vector.load %arg2[%c0_1, %c0_2] : memref<784x128xf32, #tpu.memory_space<vmem>>, vector<784x128xf32>
    %cst = arith.constant dense<0.000000e+00> : vector<8x128xf32>
    %2 = tpu.matmul %0, %1, %cst {dimension_numbers = #tpu.dot_dimension_numbers<[1], [0], [0], [1], [0, 0, 1, 1], [], []>} : vector<8x784xf32>, vector<784x128xf32>, vector<8x128xf32> -> vector<8x128xf32>
    %c0_3 = arith.constant 0 : index
    %c0_4 = arith.constant 0 : index
    %3 = vector.load %arg3[%c0_3, %c0_4] : memref<1x128xf32, #tpu.memory_space<vmem>>, vector<1x128xf32>
    %4 = vector.broadcast %3 : vector<1x128xf32> to vector<8x128xf32>
    %5 = arith.addf %2, %4 : vector<8x128xf32>
    %c0_5 = arith.constant 0 : index
    %c0_6 = arith.constant 0 : index
    %6 = vector.load %arg4[%c0_5, %c0_6] : memref<128x784xf32, #tpu.memory_space<vmem>>, vector<128x784xf32>
    %cst_7 = arith.constant dense<0.000000e+00> : vector<8x784xf32>
    %7 = tpu.matmul %5, %6, %cst_7 {dimension_numbers = #tpu.dot_dimension_numbers<[1], [0], [0], [1], [0, 0, 1, 1], [], []>} : vector<8x128xf32>, vector<128x784xf32>, vector<8x784xf32> -> vector<8x784xf32>
    %c0_8 = arith.constant 0 : index
    %c0_9 = arith.constant 0 : index
    %8 = vector.load %arg5[%c0_8, %c0_9] : memref<1x784xf32, #tpu.memory_space<vmem>>, vector<1x784xf32>
    %9 = vector.broadcast %8 : vector<1x784xf32> to vector<8x784xf32>
    %10 = arith.addf %7, %9 : vector<8x784xf32>
    %11 = math.tanh %10 : vector<8x784xf32>
    %c0_10 = arith.constant 0 : index
    %c0_11 = arith.constant 0 : index
    %12 = vector.load %arg6[%c0_10, %c0_11] : memref<8x784xf32, #tpu.memory_space<vmem>>, vector<8x784xf32>
    tpu.vector_store %arg6[%c0_10, %c0_11], %11 {strides = array<i32>} : memref<8x784xf32, #tpu.memory_space<vmem>>, vector<8x784xf32>,
    return
  }
  func.func @transform_0(%arg0: i32) -> (i32, i32) {
    %c0_i32 = arith.constant 0 : i32
    %c0_i32_0 = arith.constant 0 : i32
    return %arg0, %c0_i32 : i32, i32
  }
  func.func @transform_1(%arg0: i32) -> (i32, i32) {
    %c0_i32 = arith.constant 0 : i32
    %c0_i32_0 = arith.constant 0 : i32
    %c0_i32_1 = arith.constant 0 : i32
    return %c0_i32, %c0_i32_0 : i32, i32
  }
  func.func @transform_2(%arg0: i32) -> (i32, i32) {
    %c0_i32 = arith.constant 0 : i32
    %c0_i32_0 = arith.constant 0 : i32
    %c0_i32_1 = arith.constant 0 : i32
    return %c0_i32, %c0_i32_0 : i32, i32
  }
  func.func @transform_3(%arg0: i32) -> (i32, i32) {
    %c0_i32 = arith.constant 0 : i32
    %c0_i32_0 = arith.constant 0 : i32
    %c0_i32_1 = arith.constant 0 : i32
    return %c0_i32, %c0_i32_0 : i32, i32
  }
  func.func @transform_4(%arg0: i32) -> (i32, i32) {
    %c0_i32 = arith.constant 0 : i32
    %c0_i32_0 = arith.constant 0 : i32
    %c0_i32_1 = arith.constant 0 : i32
    return %c0_i32, %c0_i32_0 : i32, i32
  }
  func.func @transform_5(%arg0: i32) -> (i32, i32) {
    %c0_i32 = arith.constant 0 : i32
    %c0_i32_0 = arith.constant 0 : i32
    return %arg0, %c0_i32 : i32, i32
  }
}

</mosaic_0001>

<bundles_post_ra>
// kernel: general_ae_forward.1
= control target key start
LH: loop header
LB: loop body
LE: loop exit
PB: predicated region body
PF: predicated region fallthrough
CT: control target
= control target key end

     0   :  { %v1498_v51 = vmov 1983009808   ;;  %v148_v53 = vlaneseq  ;;  %vm1500_vm0 = vmmov 0   ;;  %vm218_vm1 = vcmask 130048   ;;  %s2244_s0 = inlined_call_operand.vmem [shape: f32[2,784], index: 0, kind: input, shape index: {}]   ;;  %s2245_s1 = inlined_call_operand.vmem [shape: f32[784,128], index: 1, kind: input, shape index: {}]   ;;  %s2246_s2 = inlined_call_operand.vmem [shape: f32[1,128], index: 2, kind: input, shape index: {}]   ;;  %s2247_s3 = inlined_call_operand.vmem [shape: f32[128,784], index: 3, kind: input, shape index: {}]   ;;  %s2248_s4 = inlined_call_operand.vmem [shape: f32[1,784], index: 4, kind: input, shape index: {}]   ;;  %s2249_s5 = inlined_call_operand.vmem [shape: f32[2,784], index: 5, kind: output, shape index: {}]  }
   0x1   :  { %v44_v0 = vld [vmem:[%s2245_s1 + $0x80] sm:$0xff]  ;;  %v45_v1 = vld [vmem:[%s2245_s1 + $0x88] sm:$0xff]  ;;  %v46_v11 = vld [vmem:[%s2245_s1 + $0x90] sm:$0xff]  ;;  %v146_v52 = vunpack.c.l.s4 %v1498_v51  ;;  %vm1027_vm2 = vcmask 1041408   ;;  %vm1028_vm3 = vcmask 1043458   ;;  %vm1030_vm5 = vcmask 128004  }
   0x2   :  { %v28_v2 = vld [vmem:[%s2245_s1] sm:$0xff]  ;;  %v1249_v3 = vpack.c.bf16 %v45_v1, %v44_v0  ;;  %v29_v4 = vld [vmem:[%s2245_s1 + $0x8] sm:$0xff]  ;;  %v47_v13 = vld [vmem:[%s2245_s1 + $0x98] sm:$0xff] }
   0x3   :  { %v76_v5 = vld [vmem:[%s2245_s1 + $0x180] sm:$0xff]  ;;  %v77_v6 = vld [vmem:[%s2245_s1 + $0x188] sm:$0xff]  ;;  %v1251_v7 = vpack.c.bf16 %v29_v4, %v28_v2  ;;  %v30_v14 = vld [vmem:[%s2245_s1 + $0x10] sm:$0xff]  ;;  %v1253_v16 = vpack.c.bf16 %v47_v13, %v46_v11  ;;  %v147_v2 = vunpack.c.0.s8 %v146_v52 }
   0x4   :  { %v1281_v8 = vpack.c.bf16 %v77_v6, %v76_v5  ;;  %v60_v9 = vld [vmem:[%s2245_s1 + $0x100] sm:$0xff]  ;;  %v61_v10 = vld [vmem:[%s2245_s1 + $0x108] sm:$0xff]  ;;  %1250 = vmatprep.subr.bf16.mxu0 %v1249_v3  ;;  %v31_v15 = vld [vmem:[%s2245_s1 + $0x18] sm:$0xff]  ;;  %v1664_v3 = vshrl.u32 %v148_v53, 7 }
   0x5   :  { %v1283_v12 = vpack.c.bf16 %v61_v10, %v60_v9  ;;  %1252 = vmatpush3.bf16.msra.mxu0 %v1251_v7  ;;  %v1255_v17 = vpack.c.bf16 %v31_v15, %v30_v14  ;;  %v78_v18 = vld [vmem:[%s2245_s1 + $0x190] sm:$0xff]  ;;  %v79_v19 = vld [vmem:[%s2245_s1 + $0x198] sm:$0xff]  ;;  %v48_v23 = vld [vmem:[%s2245_s1 + $0xa0] sm:$0xff] }
   0x6   :  { %1282 = vmatprep.subr.bf16.mxu1 %v1281_v8  ;;  %v62_v20 = vld [vmem:[%s2245_s1 + $0x110] sm:$0xff]  ;;  %v1285_v21 = vpack.c.bf16 %v79_v19, %v78_v18  ;;  %v63_v22 = vld [vmem:[%s2245_s1 + $0x118] sm:$0xff]  ;;  %v49_v24 = vld [vmem:[%s2245_s1 + $0xa8] sm:$0xff]  ;;  %1254 = vmatprep.subr.bf16.mxu0 %v1253_v16 }
   0x7   :  { %1284 = vmatpush3.bf16.msra.mxu1 %v1283_v12  ;;  %v1287_v25 = vpack.c.bf16 %v63_v22, %v62_v20  ;;  %v1257_v26 = vpack.c.bf16 %v49_v24, %v48_v23  ;;  %v32_v27 = vld [vmem:[%s2245_s1 + $0x20] sm:$0xff]  ;;  %v33_v28 = vld [vmem:[%s2245_s1 + $0x28] sm:$0xff]  ;;  %v50_v35 = vld [vmem:[%s2245_s1 + $0xb0] sm:$0xff] }
   0x8   :  { %v80_v29 = vld [vmem:[%s2245_s1 + $0x1a0] sm:$0xff]  ;;  %1286 = vmatprep.subr.bf16.mxu1 %v1285_v21  ;;  %v81_v30 = vld [vmem:[%s2245_s1 + $0x1a8] sm:$0xff]  ;;  %v1259_v33 = vpack.c.bf16 %v33_v28, %v32_v27  ;;  %v51_v36 = vld [vmem:[%s2245_s1 + $0xb8] sm:$0xff]  ;;  %v1706_v21 = vsub.s32 %v147_v2, %v1664_v3 }
   0x9   :  { %v64_v31 = vld [vmem:[%s2245_s1 + $0x120] sm:$0xff]  ;;  %v65_v32 = vld [vmem:[%s2245_s1 + $0x128] sm:$0xff]  ;;  %1256 = vmatpush3.bf16.msra.mxu0 %v1255_v17  ;;  %v1289_v34 = vpack.c.bf16 %v81_v30, %v80_v29  ;;  %v34_v37 = vld [vmem:[%s2245_s1 + $0x30] sm:$0xff]  ;;  %v1261_v39 = vpack.c.bf16 %v51_v36, %v50_v35 }
   0xa   :  { %1258 = vmatprep.subr.bf16.mxu0 %v1257_v26  ;;  %v1291_v38 = vpack.c.bf16 %v65_v32, %v64_v31  ;;  %v35_v40 = vld [vmem:[%s2245_s1 + $0x38] sm:$0xff]  ;;  %v82_v41 = vld [vmem:[%s2245_s1 + $0x1b0] sm:$0xff]  ;;  %v52_v46 = vld [vmem:[%s2245_s1 + $0xc0] sm:$0xff] }
   0xb   :  { %1288 = vmatpush3.bf16.msra.mxu1 %v1287_v25  ;;  %v83_v42 = vld [vmem:[%s2245_s1 + $0x1b8] sm:$0xff]  ;;  %v66_v44 = vld [vmem:[%s2245_s1 + $0x130] sm:$0xff]  ;;  %v53_v47 = vld [vmem:[%s2245_s1 + $0xc8] sm:$0xff]  ;;  %v1263_v48 = vpack.c.bf16 %v35_v40, %v34_v37 }
   0xc   :  { %1290 = vmatprep.subr.bf16.mxu1 %v1289_v34  ;;  %v1293_v43 = vpack.c.bf16 %v83_v42, %v82_v41  ;;  %v67_v45 = vld [vmem:[%s2245_s1 + $0x138] sm:$0xff]  ;;  %v84_v49 = vld [vmem:[%s2245_s1 + $0x1c0] sm:$0xff]  ;;  %v85_v50 = vld [vmem:[%s2245_s1 + $0x1c8] sm:$0xff]  ;;  %v1265_v55 = vpack.c.bf16 %v53_v47, %v52_v46 }
   0xd   :  { %1260 = vmatpush3.bf16.msra.mxu0 %v1259_v33  ;;  %v1295_v54 = vpack.c.bf16 %v67_v45, %v66_v44  ;;  %v36_v56 = vld [vmem:[%s2245_s1 + $0x40] sm:$0xff]  ;;  %v37_v57 = vld [vmem:[%s2245_s1 + $0x48] sm:$0xff]  ;;  %v1297_v59 = vpack.c.bf16 %v85_v50, %v84_v49  ;;  %v54_v61 = vld [vmem:[%s2245_s1 + $0xd0] sm:$0xff] }
   0xe   :  { %1262 = vmatprep.subr.bf16.mxu0 %v1261_v39  ;;  %v68_v58 = vld [vmem:[%s2245_s1 + $0x140] sm:$0xff]  ;;  %v69_v60 = vld [vmem:[%s2245_s1 + $0x148] sm:$0xff]  ;;  %v55_v62 = vld [vmem:[%s2245_s1 + $0xd8] sm:$0xff]  ;;  %v1267_v1 = vpack.c.bf16 %v37_v57, %v36_v56 }
   0xf   :  { %1292 = vmatpush3.bf16.msra.mxu1 %v1291_v38  ;;  %v86_v63 = vld [vmem:[%s2245_s1 + $0x1d0] sm:$0xff]  ;;  %v87_v0 = vld [vmem:[%s2245_s1 + $0x1d8] sm:$0xff]  ;;  %v1299_v4 = vpack.c.bf16 %v69_v60, %v68_v58  ;;  %v1269_v5 = vpack.c.bf16 %v55_v62, %v54_v61  ;;  %v56_v11 = vld [vmem:[%s2245_s1 + $0xe0] sm:$0xff] }
  0x10   :  { %1294 = vmatprep.subr.bf16.mxu1 %v1293_v43  ;;  %v38_v6 = vld [vmem:[%s2245_s1 + $0x50] sm:$0xff]  ;;  %v39_v7 = vld [vmem:[%s2245_s1 + $0x58] sm:$0xff]  ;;  %v1301_v9 = vpack.c.bf16 %v87_v0, %v86_v63  ;;  %v57_v12 = vld [vmem:[%s2245_s1 + $0xe8] sm:$0xff]  ;;  %v1499_v63 = vmov 0.0|0.0  }
  0x11   :  { %1264 = vmatpush3.bf16.msra.mxu0 %v1263_v48  ;;  %v70_v8 = vld [vmem:[%s2245_s1 + $0x150] sm:$0xff]  ;;  %v71_v10 = vld [vmem:[%s2245_s1 + $0x158] sm:$0xff]  ;;  %v40_v13 = vld [vmem:[%s2245_s1 + $0x60] sm:$0xff]  ;;  %v1271_v17 = vpack.c.bf16 %v39_v7, %v38_v6  ;;  %v1273_v23 = vpack.c.bf16 %v57_v12, %v56_v11  ;;  %v1501_v11 = vmov 0.0  }
  0x12   :  { %1266 = vmatprep.subr.bf16.mxu0 %v1265_v55  ;;  %v41_v14 = vld [vmem:[%s2245_s1 + $0x68] sm:$0xff]  ;;  %v88_v15 = vld [vmem:[%s2245_s1 + $0x1e0] sm:$0xff]  ;;  %v58_v20 = vld [vmem:[%s2245_s1 + $0xf0] sm:$0xff]  ;;  %v1303_v22 = vpack.c.bf16 %v71_v10, %v70_v8 }
  0x13   :  { %1296 = vmatpush3.bf16.msra.mxu1 %v1295_v54  ;;  %v89_v16 = vld [vmem:[%s2245_s1 + $0x1e8] sm:$0xff]  ;;  %v72_v18 = vld [vmem:[%s2245_s1 + $0x160] sm:$0xff]  ;;  %v59_v25 = vld [vmem:[%s2245_s1 + $0xf8] sm:$0xff]  ;;  %v1275_v30 = vpack.c.bf16 %v41_v14, %v40_v13 }
  0x14   :  { %1298 = vmatprep.subr.bf16.mxu1 %v1297_v59  ;;  %v73_v19 = vld [vmem:[%s2245_s1 + $0x168] sm:$0xff]  ;;  %v1305_v24 = vpack.c.bf16 %v89_v16, %v88_v15  ;;  %v90_v28 = vld [vmem:[%s2245_s1 + $0x1f0] sm:$0xff]  ;;  %v91_v29 = vld [vmem:[%s2245_s1 + $0x1f8] sm:$0xff]  ;;  %v1277_v36 = vpack.c.bf16 %v59_v25, %v58_v20 }
  0x15   :  { %1268 = vmatpush3.bf16.msra.mxu0 %v1267_v1  ;;  %v1472_v26 = vld [vmem:[%s2244_s0] ss:$14 sps:$4 sm:$0xff]   ;;  %v1474_v27 = vld [vmem:[%s2244_s0 + $0x1c] ss:$14 sps:$4 sm:$0xff]   ;;  %v1476_v33 = vld [vmem:[%s2244_s0 + $0x4] ss:$14 sps:$4 sm:$0xff]   ;;  %v1307_v35 = vpack.c.bf16 %v73_v19, %v72_v18  ;;  %v1309_v40 = vpack.c.bf16 %v91_v29, %v90_v28 }
  0x16   :  { %1270 = vmatprep.subr.bf16.mxu0 %v1269_v5  ;;  %v151_v31 = vrot.slane %v1472_v26, %v1706_v21  ;;  %v165_v32 = vrot.slane %v1474_v27, %v1706_v21  ;;  %v1477_v34 = vld [vmem:[%s2244_s0 + $0x20] ss:$14 sps:$4 sm:$0xff]   ;;  %v43_v38 = vld [vmem:[%s2245_s1 + $0x78] sm:$0xff]  ;;  %v158_v45 = vrot.slane %v1476_v33, %v1706_v21  ;;  %v1481_v8 = vld [vmem:[%s2244_s0 + $0x24] ss:$14 sps:$4 sm:$0xff]  }
  0x17   :  { %1300 = vmatpush3.bf16.msra.mxu1 %v1299_v4  ;;  %v42_v37 = vld [vmem:[%s2245_s1 + $0x70] sm:$0xff]  ;;  %v75_v42 = vld [vmem:[%s2245_s1 + $0x178] sm:$0xff]  ;;  %v108_v43 = vld [vmem:[%s2245_s1 + $0x280] sm:$0xff]  ;;  %v172_v46 = vrot.slane %v1477_v34, %v1706_v21 }
  0x18   :  { %1302 = vmatprep.subr.bf16.mxu1 %v1301_v9  ;;  %v74_v39 = vld [vmem:[%s2245_s1 + $0x170] sm:$0xff]  ;;  %v174_v41 = vcombine.high %v151_v31, %v165_v32  ;;  %v109_v44 = vld [vmem:[%s2245_s1 + $0x288] sm:$0xff]  ;;  %v1279_v47 = vpack.c.bf16 %v43_v38, %v42_v37  ;;  %v92_v51 = vld [vmem:[%s2245_s1 + $0x200] sm:$0xff]  ;;  %v173_v55 = vcombine.low %v151_v31, %v165_v32 }
  0x19   :  { %1272 = vmatpush3.bf16.msra.mxu0 %v1271_v17  ;;  %v176_v48 = vcombine.high %v158_v45, %v172_v46  ;;  %v1311_v49 = vpack.c.bf16 %v75_v42, %v74_v39  ;;  %v1313_v50 = vpack.c.bf16 %v109_v44, %v108_v43  ;;  %v93_v52 = vld [vmem:[%s2245_s1 + $0x208] sm:$0xff]  ;;  %v110_v53 = vld [vmem:[%s2245_s1 + $0x290] sm:$0xff]  ;;  %v111_v54 = vld [vmem:[%s2245_s1 + $0x298] sm:$0xff]  ;;  %v175_v57 = vcombine.low %v158_v45, %v172_v46 }
  0x1a   :  { %1274 = vmatprep.subr.bf16.mxu0 %v1273_v23  ;;  %285 = vmatprep.mubr.f32.mxu0 %v174_v41  ;;  %v1315_v56 = vpack.c.bf16 %v93_v52, %v92_v51  ;;  %v1317_v58 = vpack.c.bf16 %v111_v54, %v110_v53  ;;  %v94_v59 = vld [vmem:[%s2245_s1 + $0x210] sm:$0xff]  ;;  %v95_v60 = vld [vmem:[%s2245_s1 + $0x218] sm:$0xff]  ;;  %v112_v61 = vld [vmem:[%s2245_s1 + $0x2a0] sm:$0xff]  ;;  %v201_v17 = vrot.slane %v1481_v8, %v1706_v21 }
  0x1b   :  { %1304 = vmatpush3.bf16.msra.mxu1 %v1303_v22  ;;  %355 = vmatprep.mubr.f32.mxu1 %v176_v48  ;;  %v113_v62 = vld [vmem:[%s2245_s1 + $0x2a8] sm:$0xff]  ;;  %v96_v0 = vld [vmem:[%s2245_s1 + $0x220] sm:$0xff]  ;;  %v1319_v2 = vpack.c.bf16 %v95_v60, %v94_v59  ;;  %v114_v12 = vld [vmem:[%s2245_s1 + $0x2b0] sm:$0xff] }
  0x1c   :  { %1306 = vmatprep.subr.bf16.mxu1 %v1305_v24  ;;  %v97_v1 = vld [vmem:[%s2245_s1 + $0x228] sm:$0xff]  ;;  %v124_v6 = vld [vmem:[%s2245_s1 + $0x300] sm:$0xff]  ;;  %v1321_v7 = vpack.c.bf16 %v113_v62, %v112_v61  ;;  %v115_v13 = vld [vmem:[%s2245_s1 + $0x2b8] sm:$0xff] }
  0x1d   :  { %1276 = vmatpush3.bf16.msra.mxu0 %v1275_v30  ;;  %v1478_v4 = vld [vmem:[%s2244_s0 + $0x8] ss:$14 sps:$4 sm:$0xff]   ;;  %v1480_v5 = vld [vmem:[%s2244_s0 + $0xc] ss:$14 sps:$4 sm:$0x33]   ;;  %v1323_v19 = vpack.c.bf16 %v97_v1, %v96_v0  ;;  %v1325_v20 = vpack.c.bf16 %v115_v13, %v114_v12  ;;  %v116_v26 = vld [vmem:[%s2245_s1 + $0x2c0] sm:$0xff] }
  0x1e   :  { %1278 = vmatprep.subr.bf16.mxu0 %v1277_v36  ;;  %v1483_v9 = vld [vmem:[%s2244_s0 + $0x28] ss:$14 sps:$4 sm:$0x33]   ;;  %v187_v14 = vrot.slane %v1478_v4, %v1706_v21  ;;  %v194_v15 = vrot.slane %v1480_v5, %v1706_v21  ;;  %v99_v23 = vld [vmem:[%s2245_s1 + $0x238] sm:$0xff]  ;;  %v100_v30 = vld [vmem:[%s2245_s1 + $0x240] sm:$0xff] }
  0x1f   :  { %1308 = vmatpush3.bf16.msra.mxu1 %v1307_v35  ;;  %v125_v10 = vld [vmem:[%s2245_s1 + $0x308] sm:$0xff]  ;;  %v208_v18 = vrot.slane %v1483_v9, %v1706_v21  ;;  %v98_v22 = vld [vmem:[%s2245_s1 + $0x230] sm:$0xff]  ;;  %v119_v33 = vld [vmem:[%s2245_s1 + $0x2d8] sm:$0xff] }
  0x20   :  { %1310 = vmatprep.subr.bf16.mxu1 %v1309_v40  ;;  %v1346_v16 = vpack.c.bf16 %v125_v10, %v124_v6  ;;  %v210_v24 = vcombine.high %v187_v14, %v201_v17  ;;  %v117_v27 = vld [vmem:[%s2245_s1 + $0x2c8] sm:$0xff]  ;;  %v1327_v28 = vpack.c.bf16 %v99_v23, %v98_v22  ;;  %v118_v32 = vld [vmem:[%s2245_s1 + $0x2d0] sm:$0xff]  ;;  %v103_v37 = vld [vmem:[%s2245_s1 + $0x258] sm:$0xff]  ;;  %v209_v51 = vcombine.low %v187_v14, %v201_v17 }
  0x21   :  { %1280 = vmatpush3.bf16.msra.mxu0 %v1279_v47  ;;  %v211_v25 = vcombine.low %v194_v15, %v208_v18  ;;  %v1329_v29 = vpack.c.bf16 %v117_v27, %v116_v26  ;;  %v101_v31 = vld [vmem:[%s2245_s1 + $0x248] sm:$0xff]  ;;  %v1333_v35 = vpack.c.bf16 %v119_v33, %v118_v32  ;;  %v102_v36 = vld [vmem:[%s2245_s1 + $0x250] sm:$0xff]  ;;  %v120_v38 = vld [vmem:[%s2245_s1 + $0x2e0] sm:$0xff] }
  0x22   :  { %1314 = vmatprep.subr.bf16.mxu0 %v1313_v50  ;;  %v1331_v34 = vpack.c.bf16 %v101_v31, %v100_v30  ;;  %v121_v39 = vld [vmem:[%s2245_s1 + $0x2e8] sm:$0xff]  ;;  %v1335_v40 = vpack.c.bf16 %v103_v37, %v102_v36  ;;  %v104_v42 = vld [vmem:[%s2245_s1 + $0x260] sm:$0xff]  ;;  %v122_v44 = vld [vmem:[%s2245_s1 + $0x2f0] sm:$0xff] }
  0x23   :  { %1312 = vmatpush3.bf16.msra.mxu1 %v1311_v49  ;;  %v1337_v41 = vpack.c.bf16 %v121_v39, %v120_v38  ;;  %v105_v43 = vld [vmem:[%s2245_s1 + $0x268] sm:$0xff]  ;;  %v123_v45 = vld [vmem:[%s2245_s1 + $0x2f8] sm:$0xff]  ;;  %v106_v48 = vld [vmem:[%s2245_s1 + $0x270] sm:$0xff] }
  0x24   :  { %1345 = vmatprep.subr.bf16.mxu1 %v1499_v63  ;;  %286 = vmatmul.mubr.f32.vlgmr.msra.gmra.mrb[0].mxu0 %v173_v55  ;;  %v1339_v46 = vpack.c.bf16 %v105_v43, %v104_v42  ;;  %v1341_v47 = vpack.c.bf16 %v123_v45, %v122_v44  ;;  %v107_v49 = vld [vmem:[%s2245_s1 + $0x278] sm:$0xff]  ;;  %v502_v52 = vld [vmem:[%s2247_s3 + $0x8] sm:$0xff]  ;;  %v509_v53 = vld [vmem:[%s2247_s3 + $0x40] sm:$0xff] }
  0x25   :  { %1316 = vmatpush3.bf16.msra.mxu0 %v1315_v56  ;;  %425 = vmatprep.mubr.f32.mxu0 %v210_v24  ;;  %v1343_v50 = vpack.c.bf16 %v107_v49, %v106_v48  ;;  %v504_v54 = vld [vmem:[%s2247_s3 + $0x18] sm:$0xff]  ;;  %v1348_v55 = vpack.c.bf16 %v509_v53, %v502_v52  ;;  %v511_v56 = vld [vmem:[%s2247_s3 + $0x50] sm:$0xff]  ;;  %v510_v62 = vld [vmem:[%s2247_s3 + $0x48] sm:$0xff] }
  0x26   :  { %356 = vmatmul.mubr.f32.vlgmr.msra.gmra.mrb[0].mxu1 %v175_v57  ;;  %1318 = vmatprep.subr.bf16.mxu0 %v1317_v58  ;;  %v501_v57 = vld [vmem:[%s2247_s3] sm:$0xff]  ;;  %v508_v58 = vld [vmem:[%s2247_s3 + $0x38] sm:$0xff]  ;;  %v1380_v59 = vpack.c.bf16 %v511_v56, %v504_v54  ;;  %v503_v61 = vld [vmem:[%s2247_s3 + $0x10] sm:$0xff] }
  0x27   :  { %1211 = vmatprep.mubr.msk.f32.mxu1 %vm1500_vm0, %v1501_v11  ;;  %1347 = vmatpush3.bf16.msra.mxu1 %v1346_v16  ;;  %v1350_v60 = vpack.c.bf16 %v508_v58, %v501_v57  ;;  %v516_v0 = vld [vmem:[%s2247_s3 + $0x78] sm:$0xff]  ;;  %v1382_v1 = vpack.c.bf16 %v510_v62, %v503_v61  ;;  %v518_v4 = vld [vmem:[%s2247_s3 + $0x88] sm:$0xff]  ;;  %v525_v5 = vld [vmem:[%s2247_s3 + $0xc0] sm:$0xff] }
  0x28   :  { %1349 = vmatprep.subr.bf16.mxu1 %v1348_v55  ;;  %v515_v8 = vld [vmem:[%s2247_s3 + $0x70] sm:$0xff]  ;;  %v522_v9 = vld [vmem:[%s2247_s3 + $0xa8] sm:$0xff]  ;;  %v517_v10 = vld [vmem:[%s2247_s3 + $0x80] sm:$0xff] }
  0x29   :  { %1320 = vmatpush3.bf16.msra.mxu0 %v1319_v2  ;;  %v523_v2 = vld [vmem:[%s2247_s3 + $0xb0] sm:$0xff]  ;;  %v1354_v12 = vpack.c.bf16 %v522_v9, %v515_v8  ;;  %v524_v13 = vld [vmem:[%s2247_s3 + $0xb8] sm:$0xff]  ;;  %v530_v14 = vld [vmem:[%s2247_s3 + $0xe8] sm:$0xff] }
  0x2a   :  { %1322 = vmatprep.subr.bf16.mxu0 %v1321_v7  ;;  %1212 = vmatmul.mubr.msk.f32.vlgmr.msra.gmra.mrb[2].mxu1 %vm218_vm1, %v211_v25  ;;  %v1352_v6 = vpack.c.bf16 %v523_v2, %v516_v0  ;;  %v1384_v7 = vpack.c.bf16 %v525_v5, %v518_v4  ;;  %v537_v15 = vld [vmem:[%s2247_s3 + $0x120] sm:$0xff]  ;;  %v1386_v16 = vpack.c.bf16 %v524_v13, %v517_v10  ;;  %v532_v18 = vld [vmem:[%s2247_s3 + $0xf8] sm:$0xff]  ;;  %v531_v24 = vld [vmem:[%s2247_s3 + $0xf0] sm:$0xff] }
  0x2b   :  { %714 = vmatprep.mubr.f32.mxu1 %v1501_v11  ;;  %1351 = vmatpush1.bf16.msra.mxu1 %v1350_v60  ;;  %v1356_v17 = vpack.c.bf16 %v537_v15, %v530_v14  ;;  %v536_v23 = vld [vmem:[%s2247_s3 + $0x118] sm:$0xff]  ;;  %v538_v25 = vld [vmem:[%s2247_s3 + $0x128] sm:$0xff]  ;;  %v553_v32 = vld [vmem:[%s2247_s3 + $0x1a0] sm:$0xff] }
  0x2c   :  { %1353 = vmatprep.subr.bf16.mxu1 %v1352_v6  ;;  %v544_v27 = vld [vmem:[%s2247_s3 + $0x158] sm:$0xff]  ;;  %v1390_v30 = vpack.c.bf16 %v538_v25, %v531_v24  ;;  %v543_v33 = vld [vmem:[%s2247_s3 + $0x150] sm:$0xff]  ;;  %v545_v36 = vld [vmem:[%s2247_s3 + $0x160] sm:$0xff] }
  0x2d   :  { %1324 = vmatpush3.bf16.msra.mxu0 %v1323_v19  ;;  %v539_v19 = vld [vmem:[%s2247_s3 + $0x130] sm:$0xff]  ;;  %v552_v37 = vld [vmem:[%s2247_s3 + $0x198] sm:$0xff]  ;;  %v558_v38 = vld [vmem:[%s2247_s3 + $0x1c8] sm:$0xff] }
  0x2e   :  { %1326 = vmatprep.subr.bf16.mxu0 %v1325_v20  ;;  %v529_v20 = vld [vmem:[%s2247_s3 + $0xe0] sm:$0xff]  ;;  %v1388_v22 = vpack.c.bf16 %v539_v19, %v532_v18  ;;  %v1394_v43 = vpack.c.bf16 %v552_v37, %v545_v36  ;;  %v566_v49 = vld [vmem:[%s2247_s3 + $0x208] sm:$0xff]  ;;  %v571_v57 = vld [vmem:[%s2247_s3 + $0x230] sm:$0xff] }
  0x2f   :  { %1355 = vmatpush1.bf16.msra.mxu1 %v1354_v12  ;;  %v1358_v26 = vpack.c.bf16 %v536_v23, %v529_v20  ;;  %v565_v39 = vld [vmem:[%s2247_s3 + $0x200] sm:$0xff]  ;;  %v574_v52 = vld [vmem:[%s2247_s3 + $0x248] sm:$0xff]  ;;  %v580_v61 = vld [vmem:[%s2247_s3 + $0x278] sm:$0xff] }
  0x30   :  { %1357 = vmatprep.subr.bf16.mxu1 %v1356_v17  ;;  %v1364_v44 = vpack.c.bf16 %v565_v39, %v558_v38  ;;  %v557_v45 = vld [vmem:[%s2247_s3 + $0x1c0] sm:$0xff]  ;;  %v578_v58 = vld [vmem:[%s2247_s3 + $0x268] sm:$0xff]  ;;  %v595_v2 = vld [vmem:[%s2247_s3 + $0x2f0] sm:$0xff] }
  0x31   :  { %1328 = vmatpush3.bf16.msra.mxu0 %v1327_v28  ;;  %v551_v28 = vld [vmem:[%s2247_s3 + $0x190] sm:$0xff]  ;;  %v581_v53 = vld [vmem:[%s2247_s3 + $0x280] sm:$0xff]  ;;  %v586_v62 = vld [vmem:[%s2247_s3 + $0x2a8] sm:$0xff]  ;;  %v1370_v4 = vpack.c.bf16 %v578_v58, %v571_v57 }
  0x32   :  { %1330 = vmatprep.subr.bf16.mxu0 %v1329_v29  ;;  %v546_v29 = vld [vmem:[%s2247_s3 + $0x168] sm:$0xff]  ;;  %v1360_v31 = vpack.c.bf16 %v551_v28, %v544_v27  ;;  %v1400_v60 = vpack.c.bf16 %v581_v53, %v574_v52  ;;  %v593_v0 = vld [vmem:[%s2247_s3 + $0x2e0] sm:$0xff]  ;;  %v592_v9 = vld [vmem:[%s2247_s3 + $0x2d8] sm:$0xff] }
  0x33   :  { %1359 = vmatpush1.bf16.msra.mxu1 %v1358_v26  ;;  %v1372_v6 = vpack.c.bf16 %v593_v0, %v586_v62  ;;  %v585_v8 = vld [vmem:[%s2247_s3 + $0x2a0] sm:$0xff]  ;;  %v587_v10 = vld [vmem:[%s2247_s3 + $0x2b0] sm:$0xff]  ;;  %v594_v13 = vld [vmem:[%s2247_s3 + $0x2e8] sm:$0xff] }
  0x34   :  { %1361 = vmatprep.subr.bf16.mxu1 %v1360_v31  ;;  %v1374_v12 = vpack.c.bf16 %v592_v9, %v585_v8  ;;  %v1406_v14 = vpack.c.bf16 %v594_v13, %v587_v10  ;;  %v600_v15 = vld [vmem:[%s2247_s3 + $0x318] sm:$0xff]  ;;  %v602_v17 = vld [vmem:[%s2247_s3 + $0x328] sm:$0xff]  ;;  %v609_v19 = vld [vmem:[%s2247_s3 + $0x360] sm:$0xff] }
  0x35   :  { %1332 = vmatpush3.bf16.msra.mxu0 %v1331_v34  ;;  %v550_v34 = vld [vmem:[%s2247_s3 + $0x188] sm:$0xff]  ;;  %v599_v20 = vld [vmem:[%s2247_s3 + $0x310] sm:$0xff]  ;;  %v1408_v23 = vpack.c.bf16 %v609_v19, %v602_v17  ;;  %v601_v25 = vld [vmem:[%s2247_s3 + $0x320] sm:$0xff] }
  0x36   :  { %1334 = vmatprep.subr.bf16.mxu0 %v1333_v35  ;;  %v1392_v35 = vpack.c.bf16 %v553_v32, %v546_v29  ;;  %v1362_v42 = vpack.c.bf16 %v550_v34, %v543_v33  ;;  %v608_v26 = vld [vmem:[%s2247_s3 + $0x358] sm:$0xff]  ;;  %v506_v28 = vld [vmem:[%s2247_s3 + $0x28] sm:$0xff]  ;;  %v513_v29 = vld [vmem:[%s2247_s3 + $0x60] sm:$0xff] }
  0x37   :  { %v1410_v27 = vpack.c.bf16 %v608_v26, %v601_v25  ;;  %v1079_v32 = vld [vmem:[%s2246_s2] ss:$0 sm:$0xff]  ;;  %v526_v57 = vld [vmem:[%s2247_s3 + $0xc8] sm:$0xff]  ;;  %v555_v8 = vld [vmem:[%s2247_s3 + $0x1b0] sm:$0xff] }
  0x38   :  { %1363 = vmatpush1.bf16.msra.mxu1 %v1362_v42  ;;  %v521_v58 = vld [vmem:[%s2247_s3 + $0xa0] sm:$0xff]  ;;  %v570_v25 = vld [vmem:[%s2247_s3 + $0x228] sm:$0xff]  ;;  %v576_v26 = vld [vmem:[%s2247_s3 + $0x258] sm:$0xff] }
  0x39   :  { %1336 = vmatpush3.bf16.msra.mxu0 %v1335_v40  ;;  %v560_v40 = vld [vmem:[%s2247_s3 + $0x1d8] sm:$0xff]  ;;  %1365 = vmatprep.subr.bf16.mxu1 %v1364_v44  ;;  %v505_v44 = vld [vmem:[%s2247_s3 + $0x20] sm:$0xff]  ;;  %vm1029_vm4 = vmor %vm1028_vm3, %vm1027_vm2 }
  0x3a   :  { %1338 = vmatprep.subr.bf16.mxu0 %v1337_v41  ;;  %v567_v41 = vld [vmem:[%s2247_s3 + $0x210] sm:$0xff]  ;;  %v569_v17 = vld [vmem:[%s2247_s3 + $0x220] sm:$0xff]  ;;  %vm1031_vm6 = vmor %vm1030_vm5, %vm1029_vm4 }
  0x3b   :  { %v1396_v48 = vpack.c.bf16 %v567_v41, %v560_v40 }
  0x3d   :  { %1340 = vmatpush3.bf16.msra.mxu0 %v1339_v46  ;;  %v564_v46 = vld [vmem:[%s2247_s3 + $0x1f8] sm:$0xff] }
  0x3e   :  { %1342 = vmatprep.subr.bf16.mxu0 %v1341_v47  ;;  %v559_v47 = vld [vmem:[%s2247_s3 + $0x1d0] sm:$0xff]  ;;  %v1366_v54 = vpack.c.bf16 %v564_v46, %v557_v45  ;;  %v512_v46 = vld [vmem:[%s2247_s3 + $0x58] sm:$0xff] }
  0x3f   :  { %v1398_v55 = vpack.c.bf16 %v566_v49, %v559_v47  ;;  %v507_v47 = vld [vmem:[%s2247_s3 + $0x30] sm:$0xff]  ;;  %v520_v49 = vld [vmem:[%s2247_s3 + $0x98] sm:$0xff]  ;;  %v1414_v52 = vpack.c.bf16 %v512_v46, %v505_v44 }
  0x40   :  { %1367 = vmatpush1.bf16.msra.mxu1 %v1366_v54  ;;  %v519_v54 = vld [vmem:[%s2247_s3 + $0x90] sm:$0xff]  ;;  %v604_v44 = vld [vmem:[%s2247_s3 + $0x338] sm:$0xff] }
  0x41   :  { %1344 = vmatpush3.bf16.msra.mxu0 %v1343_v50  ;;  %v572_v50 = vld [vmem:[%s2247_s3 + $0x238] sm:$0xff]  ;;  %v1418_v62 = vpack.c.bf16 %v526_v57, %v519_v54  ;;  %v625_v57 = vsub.s32 2, %v1664_v3 }
  0x42   :  { %1381 = vmatprep.subr.bf16.mxu0 %v1380_v59  ;;  %v573_v59 = vld [vmem:[%s2247_s3 + $0x240] sm:$0xff] }
  0x43   :  { %v1402_v5 = vpack.c.bf16 %v580_v61, %v573_v59  ;;  %v528_v59 = vld [vmem:[%s2247_s3 + $0xd8] sm:$0xff]  ;;  %v541_v61 = vld [vmem:[%s2247_s3 + $0x140] sm:$0xff] }
  0x44   :  { %426 = vmatmul.mubr.f32.vlgmr.msra.gmra.mrb[2].mxu0 %v209_v51  ;;  %v579_v51 = vld [vmem:[%s2247_s3 + $0x270] sm:$0xff]  ;;  %v1448_v0 = vpack.c.bf16 %v528_v59, %v521_v58  ;;  %v613_v58 = vld [vmem:[%s2248_s4] sm:$0x7f]  ;;  %v621_v59 = vsub.s32 1, %v1664_v3 }
  0x45   :  { %785 = vmatprep.mubr.f32.mxu0 %v1501_v11  ;;  %1383 = vmatpush1.bf16.msra.mxu0 %v1382_v1  ;;  %v1368_v56 = vpack.c.bf16 %v579_v51, %v572_v50  ;;  %v588_v1 = vld [vmem:[%s2247_s3 + $0x2b8] sm:$0xff]  ;;  %v527_v50 = vld [vmem:[%s2247_s3 + $0xd0] sm:$0xff] }
  0x46   :  { %1385 = vmatprep.subr.bf16.mxu0 %v1384_v7  ;;  %v1404_v7 = vpack.c.bf16 %v595_v2, %v588_v1  ;;  %v533_v1 = vld [vmem:[%s2247_s3 + $0x100] sm:$0xff] }
  0x47   :  { %1369 = vmatprep.subr.bf16.mxu1 %v1368_v56  ;;  %v1416_v56 = vpack.c.bf16 %v527_v50, %v520_v49  ;;  %v610_v50 = vld [vmem:[%s2247_s3 + $0x368] sm:$0xff] }
  0x48   :  { %1371 = vmatpush1.bf16.msra.mxu1 %v1370_v4  ;;  %v540_v4 = vld [vmem:[%s2247_s3 + $0x138] sm:$0xff] }
  0x49   :  { %1387 = vmatpush1.bf16.msra.mxu0 %v1386_v16  ;;  %1373 = vmatprep.subr.bf16.mxu1 %v1372_v6  ;;  %v607_v16 = vld [vmem:[%s2247_s3 + $0x350] sm:$0xff]  ;;  %v542_v6 = vld [vmem:[%s2247_s3 + $0x148] sm:$0xff]  ;;  %v1422_v9 = vpack.c.bf16 %v540_v4, %v533_v1 }
  0x4a   :  { %1389 = vmatprep.subr.bf16.mxu0 %v1388_v22  ;;  %v1376_v18 = vpack.c.bf16 %v607_v16, %v600_v15  ;;  %v606_v22 = vld [vmem:[%s2247_s3 + $0x348] sm:$0xff]  ;;  %v556_v15 = vld [vmem:[%s2247_s3 + $0x1b8] sm:$0xff] }
  0x4b   :  { %v1378_v24 = vpack.c.bf16 %v606_v22, %v599_v20  ;;  %v562_v16 = vld [vmem:[%s2247_s3 + $0x1e8] sm:$0xff]  ;;  %v561_v20 = vld [vmem:[%s2247_s3 + $0x1e0] sm:$0xff] }
  0x4c   :  { %1375 = vmatpush1.bf16.msra.mxu1 %v1374_v12  ;;  %v547_v12 = vld [vmem:[%s2247_s3 + $0x170] sm:$0xff]  ;;  %v1428_v22 = vpack.c.bf16 %v569_v17, %v562_v16 }
  0x4d   :  { %1391 = vmatpush1.bf16.msra.mxu0 %v1390_v30  ;;  %1377 = vmatprep.subr.bf16.mxu1 %v1376_v18  ;;  %v1412_v30 = vpack.c.bf16 %v513_v29, %v506_v28 }
  0x4e   :  { %1393 = vmatprep.subr.bf16.mxu0 %v1392_v35 }
  0x50   :  { %1379 = vmatpush1.bf16.msra.mxu1 %v1378_v24  ;;  %v563_v24 = vld [vmem:[%s2247_s3 + $0x1f0] sm:$0xff] }
  0x51   :  { %1395 = vmatpush1.bf16.msra.mxu0 %v1394_v43  ;;  %1413 = vmatprep.subr.bf16.mxu1 %v1412_v30  ;;  %v1457_v29 = vpack.c.bf16 %v570_v25, %v563_v24  ;;  %v575_v30 = vld [vmem:[%s2247_s3 + $0x250] sm:$0xff] }
  0x52   :  { %1397 = vmatprep.subr.bf16.mxu0 %v1396_v48  ;;  %v514_v48 = vld [vmem:[%s2247_s3 + $0x68] sm:$0xff] }
  0x53   :  { %v1445_v53 = vpack.c.bf16 %v514_v48, %v507_v47  ;;  %v603_v48 = vld [vmem:[%s2247_s3 + $0x330] sm:$0xff] }
  0x55   :  { %1399 = vmatpush1.bf16.msra.mxu0 %v1398_v55 }
  0x56   :  { %1401 = vmatprep.subr.bf16.mxu0 %v1400_v60  ;;  %v534_v60 = vld [vmem:[%s2247_s3 + $0x108] sm:$0xff] }
  0x57   :  { %v1420_v2 = vpack.c.bf16 %v541_v61, %v534_v60  ;;  %v629_v60 = vsub.s32 3, %v1664_v3 }
  0x59   :  { %1403 = vmatpush1.bf16.msra.mxu0 %v1402_v5  ;;  %v535_v5 = vld [vmem:[%s2247_s3 + $0x110] sm:$0xff] }
  0x5a   :  { %1405 = vmatprep.subr.bf16.mxu0 %v1404_v7  ;;  %v548_v7 = vld [vmem:[%s2247_s3 + $0x178] sm:$0xff]  ;;  %v1451_v10 = vpack.c.bf16 %v542_v6, %v535_v5 }
  0x5b   :  { %v1424_v13 = vpack.c.bf16 %v555_v8, %v548_v7 }
  0x5d   :  { %1407 = vmatpush1.bf16.msra.mxu0 %v1406_v14  ;;  %v554_v14 = vld [vmem:[%s2247_s3 + $0x1a8] sm:$0xff] }
  0x5e   :  { %1409 = vmatprep.subr.bf16.mxu0 %v1408_v23  ;;  %v1426_v18 = vpack.c.bf16 %v554_v14, %v547_v12  ;;  %v568_v23 = vld [vmem:[%s2247_s3 + $0x218] sm:$0xff] }
  0x5f   :  { %v1430_v28 = vpack.c.bf16 %v568_v23, %v561_v20  ;;  %v637_v20 = vsub.s32 5, %v1664_v3 }
  0x61   :  { %1411 = vmatpush1.bf16.msra.mxu0 %v1410_v27  ;;  %v583_v27 = vld [vmem:[%s2247_s3 + $0x290] sm:$0xff]  ;;  %v638_v24 = vrot.slane %v613_v58, %v637_v20 }
  0x62   :  { %1444 = vmatprep.subr.bf16.mxu0 %v1499_v63 }
  0xf7   :  { %v1114_v31 = vpop.f32.mrb[0].mxu0 }
  0xf8   :  { %v1115_v33 = vpop.f32.mrb[1].mxu0 }
  0xf9   :  { %v1149_v34 = vpop.f32.mrb[0].mxu1  ;;  %v1116_v35 = vadd.f32 %v1115_v33, %v1114_v31  ;;  %v1432_v31 = vpack.c.bf16 %v583_v27, %v576_v26  ;;  %v577_v33 = vld [vmem:[%s2247_s3 + $0x260] sm:$0xff] }
  0xfa   :  { %v1150_v36 = vpop.f32.mrb[1].mxu1 }
  0xfb   :  { %v1151_v37 = vadd.f32 %v1150_v36, %v1149_v34  ;;  %v288_v38 = vadd.f32 %v1116_v35, %v1079_v32  ;;  %v582_v32 = vld [vmem:[%s2247_s3 + $0x288] sm:$0xff]  ;;  %v584_v34 = vld [vmem:[%s2247_s3 + $0x298] sm:$0xff]  ;;  %v597_v36 = vld [vmem:[%s2247_s3 + $0x300] sm:$0xff] }
  0xfc   :  { %v590_v35 = vld [vmem:[%s2247_s3 + $0x2c8] sm:$0xff] }
  0xfd   :  { %v358_v39 = vadd.f32 %v1151_v37, %v288_v38  ;;  %v497_v40 = vpop.f32.mrb[2].mxu1  ;;  %v1434_v37 = vpack.c.bf16 %v582_v32, %v575_v30  ;;  %v1460_v38 = vpack.c.bf16 %v584_v34, %v577_v33 }
  0xfe   :  { %v1213_v41 = vpop.f32.mrb[3].mxu1 }
  0xff   :  { %v596_v41 = vld [vmem:[%s2247_s3 + $0x2f8] sm:$0xff] }
 0x117   :  { %v1184_v42 = vpop.f32.mrb[2].mxu0 }
 0x118   :  { %v1185_v43 = vpop.f32.mrb[3].mxu0 }
 0x119   :  { %v1186_v45 = vadd.f32 %v1185_v43, %v1184_v42  ;;  %v591_v42 = vld [vmem:[%s2247_s3 + $0x2d0] sm:$0xff]  ;;  %v598_v43 = vld [vmem:[%s2247_s3 + $0x308] sm:$0xff] }
 0x11a   :  { %v1463_v47 = vpack.c.bf16 %v598_v43, %v591_v42 }
 0x11b   :  { %v428_v51 = vadd.f32 %v1186_v45, %v358_v39  ;;  %v589_v39 = vld [vmem:[%s2247_s3 + $0x2c0] sm:$0xff]  ;;  %v611_v45 = vld [vmem:[%s2247_s3 + $0x370] sm:$0xff] }
 0x11c   :  { %v1438_v46 = vpack.c.bf16 %v596_v41, %v589_v39  ;;  %v1440_v49 = vpack.c.bf16 %v611_v45, %v604_v44 }
 0x11d   :  { %v2091_v55 = vadd.f32 %v497_v40, %v428_v51  ;;  %v1436_v40 = vpack.c.bf16 %v597_v36, %v590_v35  ;;  %v605_v51 = vld [vmem:[%s2247_s3 + $0x340] sm:$0xff] }
 0x11f   :  { %715 = vmatmul.mubr.f32.vlgmr.msra.gmra.mrb[4].mxu1 %v2091_v55  ;;  %786 = vmatmul.mubr.f32.vlgmr.msra.gmra.mrb[4].mxu0 %v2091_v55 }
 0x120   :  { %1415 = vmatpush1.bf16.msra.mxu1 %v1414_v52  ;;  %1446 = vmatpush3.bf16.msra.mxu0 %v1445_v53  ;;  %v612_v52 = vld [vmem:[%s2247_s3 + $0x378] sm:$0xff]  ;;  %v1442_v53 = vpack.c.bf16 %v610_v50, %v603_v48 }
 0x121   :  { %1417 = vmatprep.subr.bf16.mxu1 %v1416_v56  ;;  %1447 = vmatprep.subr.bf16.mxu0 %v1499_v63  ;;  %v1466_v54 = vpack.c.bf16 %v612_v52, %v605_v51  ;;  %v617_v56 = vsub.s32 0, %v1664_v3 }
 0x122   :  { %856 = vmatprep.mubr.f32.mxu1 %v1501_v11  ;;  %1246 = vmatprep.mubr.msk.f32.mxu0 %vm1500_vm0, %v1501_v11  ;;  %v549_v11 = vld [vmem:[%s2247_s3 + $0x180] sm:$0xff] }
 0x123   :  { %v1454_v19 = vpack.c.bf16 %v556_v15, %v549_v11  ;;  %v618_v61 = vrot.slane %v613_v58, %v617_v56 }
 0x124   :  { %1419 = vmatpush1.bf16.msra.mxu1 %v1418_v62  ;;  %1449 = vmatpush3.bf16.msra.mxu0 %v1448_v0  ;;  %v622_v62 = vrot.slane %v613_v58, %v621_v59  ;;  %v630_v0 = vrot.slane %v613_v58, %v629_v60 }
 0x125   :  { %1421 = vmatprep.subr.bf16.mxu1 %v1420_v2  ;;  %1450 = vmatprep.subr.bf16.mxu0 %v1499_v63 }
 0x128   :  { %1423 = vmatpush1.bf16.msra.mxu1 %v1422_v9  ;;  %1452 = vmatpush3.bf16.msra.mxu0 %v1451_v10 }
 0x129   :  { %1425 = vmatprep.subr.bf16.mxu1 %v1424_v13  ;;  %1453 = vmatprep.subr.bf16.mxu0 %v1499_v63 }
 0x12c   :  { %1427 = vmatpush1.bf16.msra.mxu1 %v1426_v18  ;;  %1455 = vmatpush3.bf16.msra.mxu0 %v1454_v19  ;;  %v633_v18 = vsub.s32 4, %v1664_v3  ;;  %v641_v19 = vsub.s32 6, %v1664_v3 }
 0x12d   :  { %1429 = vmatprep.subr.bf16.mxu1 %v1428_v22  ;;  %1456 = vmatprep.subr.bf16.mxu0 %v1499_v63 }
 0x12e   :  { %v634_v22 = vrot.slane %v613_v58, %v633_v18  ;;  %v642_v23 = vrot.slane %v613_v58, %v641_v19 }
 0x130   :  { %1431 = vmatpush1.bf16.msra.mxu1 %v1430_v28  ;;  %1458 = vmatpush3.bf16.msra.mxu0 %v1457_v29 }
 0x131   :  { %1433 = vmatprep.subr.bf16.mxu1 %v1432_v31  ;;  %1459 = vmatprep.subr.bf16.mxu0 %v1499_v63 }
 0x134   :  { %1435 = vmatpush1.bf16.msra.mxu1 %v1434_v37  ;;  %1461 = vmatpush3.bf16.msra.mxu0 %v1460_v38 }
 0x135   :  { %1437 = vmatprep.subr.bf16.mxu1 %v1436_v40  ;;  %1462 = vmatprep.subr.bf16.mxu0 %v1499_v63 }
 0x138   :  { %1439 = vmatpush1.bf16.msra.mxu1 %v1438_v46  ;;  %1464 = vmatpush3.bf16.msra.mxu0 %v1463_v47 }
 0x139   :  { %1441 = vmatprep.subr.bf16.mxu1 %v1440_v49  ;;  %1465 = vmatprep.subr.bf16.mxu0 %v1499_v63  ;;  %v626_v63 = vrot.slane %v613_v58, %v625_v57 }
 0x13c   :  { %1443 = vmatpush1.bf16.msra.mxu1 %v1442_v53  ;;  %1467 = vmatpush3.bf16.msra.mxu0 %v1466_v54 }
 0x13f   :  { %857 = vmatmul.mubr.f32.vlgmr.msra.gmra.mrb[6].mxu1 %v2091_v55  ;;  %1247 = vmatmul.mubr.f32.vlgmr.msra.gmra.mrb[6].mxu0 %v2091_v55 }
 0x1f2   :  { %v716_v1 = vpop.f32.mrb[4].mxu1  ;;  %v787_v2 = vpop.f32.mrb[4].mxu0 }
 0x1f3   :  { %v717_v4 = vadd.f32 %v716_v1, %v618_v61  ;;  %v788_v55 = vadd.f32 %v787_v2, %v626_v63  ;;  %v718_v5 = vpop.f32.mrb[5].mxu1  ;;  %v789_v6 = vpop.f32.mrb[5].mxu0 }
 0x1f4   :  { %v719_v7 = vadd.f32 %v718_v5, %v622_v62  ;;  %v790_v8 = vadd.f32 %v789_v6, %v630_v0 }
 0x1f5   :  { %1484 = vtanh.f32 %v717_v4 }
 0x1f6   :  { %1486 = vtanh.f32 %v788_v55 }
 0x1f7   :  { %1488 = vtanh.f32 %v719_v7 }
 0x1f8   :  { %1490 = vtanh.f32 %v790_v8 }
 0x1ff   :  { %v1485_v9 = vpop.eup %1484 }
 0x200   :  { %v1487_v10 = vpop.eup %1486 }
 0x201   :  { %v1489_v12 = vpop.eup %1488 }
 0x202   :  { %v1491_v13 = vpop.eup %1490  ;;  %v947_v14 = vcombine.low %v1485_v9, %v1489_v12 }
 0x203   :  { %v949_v11 = vcombine.low %v1487_v10, %v1491_v13 }
 0x204   :  { %v957_v15 = vrot.slane %v947_v14, %v1706_v21 }
 0x205   :  { %v971_v16 = vrot.slane %v949_v11, %v1706_v21 }
 0x207   :  { %v979_v17 = vcombine.low %v957_v15, %v971_v16 }
 0x209   :  { %1056 = vst [vmem:[%s2249_s5] sm:$0xff] %v979_v17 }
 0x212   :  { %v858_v25 = vpop.f32.mrb[6].mxu1  ;;  %v929_v26 = vpop.f32.mrb[6].mxu0 }
 0x213   :  { %v859_v27 = vadd.f32 %v858_v25, %v634_v22  ;;  %v930_v28 = vadd.f32 %v929_v26, %v642_v23  ;;  %v860_v29 = vpop.f32.mrb[7].mxu1  ;;  %v1248_v30 = vpop.f32.mrb[7].mxu0 }
 0x214   :  { %v861_v31 = vadd.f32 %v860_v29, %v638_v24 }
 0x215   :  { %1492 = vtanh.f32 %v859_v27 }
 0x216   :  { %1494 = vtanh.f32 %v930_v28 }
 0x217   :  { %1496 = vtanh.f32 %v861_v31 }
 0x21f   :  { %v1493_v32 = vpop.eup %1492 }
 0x220   :  { %v1495_v33 = vpop.eup %1494 }
 0x221   :  { %v1497_v34 = vpop.eup %1496  ;;  %v1006_v3 = vrot.slane %v1495_v33, %v1706_v21 }
 0x222   :  { %v983_v35 = vcombine.low %v1493_v32, %v1497_v34 }
 0x224   :  { %v992_v36 = vrot.slane %v983_v35, %v1706_v21 }
 0x226   :  { %v1014_v37 = vcombine.low %v992_v36, %v1006_v3 }
 0x228   :  { %1032 = vst.msk [vmem:[#allocation2 + $0x8] sm:$0x3f] %vm1031_vm6, %v1014_v37 }
 0x22f   :  { %v1066_v38 = vld [vmem:[#allocation2 + $0x8] sm:$0x3f] }
 0x230   :  { %1081 = vst [vmem:[%s2249_s5 + $0x8] sm:$0x3f] %v1066_v38 }

</bundles_post_ra>
